<compile_context>
chip_gen: v7x
topology: tpu7x:2x2x1
jax: 0.10.0
libtpu: 0.0.40
codegen_flags: <defaults>
</compile_context>

<pallas_src>
import math

import jax
import jax.numpy as jnp
from jax.experimental import pallas as pl
from jax.experimental.pallas import tpu as pltpu


def _round_up(a, b):
    return (a + b - 1) // b * b


_INV_SQRT2 = 1.0 / math.sqrt(2.0)


def ffn_kernel(x_ref, w1_ref, b1_ref, w2_ref, b2_ref, o_ref, acc_ref):
    """One (M-tile, D-chunk) step of: gelu(x @ W1 + b1) @ W2 + b2."""
    k = pl.program_id(1)

    # fc1 partial on this D-chunk: (tile_m, Hp) @ (Hp, tile_d) -> f32.
    h = jnp.dot(x_ref[...], w1_ref[0], preferred_element_type=jnp.float32)
    h = h + b1_ref[...].astype(jnp.float32)

    # Exact erf GELU (matches nn.GELU() default). gelu(0) == 0, so padded
    # D/H columns contribute nothing downstream.
    h = 0.5 * h * (1.0 + jax.lax.erf(h * _INV_SQRT2))

    # fc2 partial: (tile_m, tile_d) @ (tile_d, Hp), accumulated in f32.
    partial = jnp.dot(h.astype(w2_ref.dtype), w2_ref[...],
                      preferred_element_type=jnp.float32)

    @pl.when(k == 0)
    def _():
        # First D-chunk: plain assign (saves a zero-fill + read of the f32 acc).
        acc_ref[...] = partial

    @pl.when(k > 0)
    def _():
        acc_ref[...] += partial

    @pl.when(k == pl.num_programs(1) - 1)
    def _():
        # b2 added exactly once, in the finalize branch.
        y = acc_ref[...] + b2_ref[...].astype(jnp.float32)
        # Dropout: identity in eval mode.
        # TODO(synk): training-mode dropout (prng mask + 1/(1-p) scale) not implemented.
        o_ref[...] = y.astype(o_ref.dtype)


def _device_config():
    """Generation-specific tile defaults and VMEM budgets."""
    kind = ""
    try:
        kind = jax.devices()[0].device_kind.lower()
    except Exception:
        pass
    if "v5 lite" in kind or "v5e" in kind or "v5litepod" in kind:
        # v5e: 197 TF/s, ~0.82 TB/s -> tile_m~256 is already near compute-bound;
        # mainly raise the scoped VMEM limit above the 16 MiB default.
        return dict(tile_m=256, tile_d=512, budget=88 << 20, phys=120 << 20,
                    two_tc=False)
    if "7" in kind:
        # v7x: 64 MiB VMEM per TC, 2 TCs -> keep working set under ~48 MiB and
        # produce at least 2 M tiles so both TensorCores get work.
        return dict(tile_m=512, tile_d=512, budget=46 << 20, phys=60 << 20,
                    two_tc=True)
    # v6e (and other 128-MiB-VMEM chips): grow tiles to reach the MXU roofline.
    return dict(tile_m=1024, tile_d=1024, budget=100 << 20, phys=120 << 20,
                two_tc=False)


def make_feed_forward(w1, b1, w2, b2, *, tile_m=None, tile_d=None):
    """Pre-pad / re-block the FFN weights once and return an apply(x) callable.

    Weights are stored (in, out), i.e. transposed relative to torch's (out, in):
      w1: [H, D], b1: [D], w2: [D, H], b2: [H].
    Pass bf16 weights/activations for full MXU rate; accumulation is always f32.
    """
    H, D = w1.shape
    cfg = _device_config()
    w_itemsize = jnp.dtype(w1.dtype).itemsize

    Hp = _round_up(H, 128)
    td = tile_d if tile_d is not None else cfg["tile_d"]
    td = min(_round_up(td, 128), _round_up(D, 128))
    # Keep the double-buffered W1 + W2 chunks within half the VMEM budget.
    while 4 * Hp * td * w_itemsize > cfg["budget"] // 2 and td > 128:
        td = max(128, _round_up(td // 2, 128))
    Dp = _round_up(D, td)
    nk = Dp // td

    # --- one-time padding / re-blocking (hoisted out of the per-call path) ---
    w1p = jnp.pad(w1, ((0, Hp - H), (0, Dp - D)))                 # (Hp, Dp)
    # Re-block W1 so each streamed (Hp, td) D-chunk is contiguous in HBM.
    w1b = w1p.reshape(Hp, nk, td).transpose(1, 0, 2)              # (nk, Hp, td)
    b1p = jnp.pad(b1.reshape(1, D), ((0, 0), (0, Dp - D)))        # (1, Dp)
    w2p = jnp.pad(w2, ((0, Dp - D), (0, Hp - H)))                 # (Dp, Hp)
    b2p = jnp.pad(b2.reshape(1, H), ((0, 0), (0, Hp - H)))        # (1, Hp)

    tm_default = tile_m if tile_m is not None else cfg["tile_m"]

    def apply(x):
        B, S, Hx = x.shape
        assert Hx == H, "hidden_size mismatch"
        M = B * S
        x_itemsize = jnp.dtype(x.dtype).itemsize
        sublane = 16 if x_itemsize < 4 else 8

        tm = min(_round_up(tm_default, sublane), _round_up(M, sublane))
        if cfg["two_tc"] and M > sublane:
            # At least one M tile per TensorCore on 2-TC chips.
            tm = min(tm, _round_up((M + 1) // 2, sublane))

        def working_set(tm_):
            return (2 * tm_ * Hp * x_itemsize      # x tile, double-buffered
                    + 2 * tm_ * Hp * x_itemsize    # out tile, double-buffered
                    + 2 * Hp * td * w_itemsize     # W1 chunk, double-buffered
                    + 2 * td * Hp * w_itemsize     # W2 chunk, double-buffered
                    + 2 * 8 * td * 4 + 2 * 8 * Hp * 4   # biases (sublane-padded)
                    + tm_ * Hp * 4)                # f32 accumulator scratch

        while working_set(tm) > cfg["budget"] and tm > sublane:
            tm = max(sublane, _round_up(tm // 2, sublane))

        Mp = _round_up(M, tm)
        n_m = Mp // tm
        grid = (n_m, nk)

        vmem_limit = int(min(cfg["phys"],
                             max(32 << 20, working_set(tm) * 5 // 4 + (2 << 20))))

        cost = pl.CostEstimate(
            flops=4 * Mp * Hp * Dp,
            transcendentals=Mp * Dp,
            bytes_accessed=(2 * Mp * Hp * x_itemsize
                            + n_m * (2 * Hp * Dp + Dp + Hp) * w_itemsize),
        )

        x2d = jnp.pad(x.reshape(M, H), ((0, Mp - M), (0, Hp - H)))

        out2d = pl.pallas_call(
            ffn_kernel,
            out_shape=jax.ShapeDtypeStruct((Mp, Hp), x.dtype),
            grid_spec=pltpu.PrefetchScalarGridSpec(
                num_scalar_prefetch=0,
                grid=grid,
                in_specs=[
                    pl.BlockSpec((tm, Hp), lambda i, k: (i, 0)),        # x tile (resident over k)
                    pl.BlockSpec((1, Hp, td), lambda i, k: (k, 0, 0)),  # contiguous W1 D-chunk
                    pl.BlockSpec((1, td), lambda i, k: (0, k)),         # b1 D-chunk
                    pl.BlockSpec((td, Hp), lambda i, k: (k, 0)),        # W2 D-chunk
                    pl.BlockSpec((1, Hp), lambda i, k: (0, 0)),         # b2
                ],
                out_specs=pl.BlockSpec((tm, Hp), lambda i, k: (i, 0)),
                scratch_shapes=[pltpu.VMEM((tm, Hp), jnp.float32)],
            ),
            compiler_params=pltpu.CompilerParams(
                dimension_semantics=("parallel", "arbitrary"),
                vmem_limit_bytes=vmem_limit),
            cost_estimate=cost,
        )(x2d, w1b, b1p, w2p, b2p)

        return out2d[:M, :H].reshape(B, S, H)

    return apply


def init_params(key, hidden_size, hidden_dim, dtype=jnp.float32):
    """Deterministic init matching nn.Linear's U(-1/sqrt(fan_in), 1/sqrt(fan_in))."""
    k1, k2, k3, k4 = jax.random.split(key, 4)
    bound1 = 1.0 / math.sqrt(hidden_size)
    bound2 = 1.0 / math.sqrt(hidden_dim)
    # Stored transposed relative to torch's (out, in): here (in, out).
    w1 = jax.random.uniform(k1, (hidden_size, hidden_dim), dtype,
                            minval=-bound1, maxval=bound1)
    b1 = jax.random.uniform(k2, (hidden_dim,), dtype,
                            minval=-bound1, maxval=bound1)
    w2 = jax.random.uniform(k3, (hidden_dim, hidden_size), dtype,
                            minval=-bound2, maxval=bound2)
    b2 = jax.random.uniform(k4, (hidden_size,), dtype,
                            minval=-bound2, maxval=bound2)
    return w1, b1, w2, b2


if __name__ == "__main__":
    # Small config: batch=2, seq=8, hidden_size=32, hidden_dim=64.
    B, S, H, D = 2, 8, 32, 64

    key = jax.random.PRNGKey(0)
    kx, kp = jax.random.split(key)
    x = jax.random.normal(kx, (B, S, H), jnp.float32)
    w1, b1, w2, b2 = init_params(kp, H, D)

    ffn = make_feed_forward(w1, b1, w2, b2)   # one-time pad / re-block of weights
    out = jax.block_until_ready(ffn(x))

    # Pure-JAX reference check (exact GELU, eval-mode dropout).
    h_ref = jnp.dot(x, w1) + b1
    h_ref = 0.5 * h_ref * (1.0 + jax.lax.erf(h_ref / jnp.sqrt(2.0)))
    ref = jnp.dot(h_ref, w2) + b2
    assert out.shape == (B, S, H)
    assert jnp.allclose(out, ref, atol=1e-4, rtol=1e-4), "mismatch vs reference"

    print("KERNEL_OK")
</pallas_src>

<mosaic_0001>
module attributes {stable_mosaic.version = 11 : i64} {
  func.func @ffn_kernel(%arg0: i32, %arg1: i32, %arg2: memref<16x128xf32, #tpu.memory_space<vmem>>, %arg3: memref<1x128x128xf32, #tpu.memory_space<vmem>>, %arg4: memref<1x128xf32, #tpu.memory_space<vmem>>, %arg5: memref<128x128xf32, #tpu.memory_space<vmem>>, %arg6: memref<1x128xf32, #tpu.memory_space<vmem>>, %arg7: memref<16x128xf32, #tpu.memory_space<vmem>>, %arg8: memref<16x128xf32, #tpu.memory_space<vmem>>) attributes {dimension_semantics = [#tpu.dimension_semantics<parallel>, #tpu.dimension_semantics<arbitrary>], iteration_bounds = array<i64: 1, 1>, scalar_prefetch = 0 : i64, scratch_operands = 1 : i64, tpu.core_type = #tpu.core_type<tc>, window_params = [{transform_indices = @transform_0, window_bounds = array<i64: 16, 128>}, {transform_indices = @transform_1, window_bounds = array<i64: 1, 128, 128>}, {transform_indices = @transform_2, window_bounds = array<i64: 1, 128>}, {transform_indices = @transform_3, window_bounds = array<i64: 128, 128>}, {pipeline_mode = #tpu.pipeline_mode<synchronous>, transform_indices = @transform_4, window_bounds = array<i64: 1, 128>}, {transform_indices = @transform_5, window_bounds = array<i64: 16, 128>}]} {
    %c0 = arith.constant 0 : index
    %c0_0 = arith.constant 0 : index
    %0 = vector.load %arg2[%c0, %c0_0] : memref<16x128xf32, #tpu.memory_space<vmem>>, vector<16x128xf32>
    %c0_1 = arith.constant 0 : index
    %c0_2 = arith.constant 0 : index
    %c0_3 = arith.constant 0 : index
    %1 = vector.load %arg3[%c0_1, %c0_2, %c0_3] : memref<1x128x128xf32, #tpu.memory_space<vmem>>, vector<1x128x128xf32>
    %2 = vector.shape_cast %1 : vector<1x128x128xf32> to vector<128x128xf32>
    %cst = arith.constant dense<0.000000e+00> : vector<16x128xf32>
    %3 = tpu.matmul %0, %2, %cst {dimension_numbers = #tpu.dot_dimension_numbers<[1], [0], [0], [1], [0, 0, 1, 1], [], []>} : vector<16x128xf32>, vector<128x128xf32>, vector<16x128xf32> -> vector<16x128xf32>
    %c0_4 = arith.constant 0 : index
    %c0_5 = arith.constant 0 : index
    %4 = vector.load %arg4[%c0_4, %c0_5] : memref<1x128xf32, #tpu.memory_space<vmem>>, vector<1x128xf32>
    %5 = vector.broadcast %4 : vector<1x128xf32> to vector<16x128xf32>
    %6 = arith.addf %3, %5 : vector<16x128xf32>
    %cst_6 = arith.constant 5.000000e-01 : f32
    %7 = vector.broadcast %cst_6 : f32 to vector<16x128xf32>
    %8 = arith.mulf %7, %6 : vector<16x128xf32>
    %cst_7 = arith.constant 0.707106769 : f32
    %9 = vector.broadcast %cst_7 : f32 to vector<16x128xf32>
    %10 = arith.mulf %6, %9 : vector<16x128xf32>
    %11 = math.erf %10 : vector<16x128xf32>
    %cst_8 = arith.constant 1.000000e+00 : f32
    %12 = vector.broadcast %cst_8 : f32 to vector<16x128xf32>
    %13 = arith.addf %12, %11 : vector<16x128xf32>
    %14 = arith.mulf %8, %13 : vector<16x128xf32>
    %c0_9 = arith.constant 0 : index
    %c0_10 = arith.constant 0 : index
    %15 = vector.load %arg5[%c0_9, %c0_10] : memref<128x128xf32, #tpu.memory_space<vmem>>, vector<128x128xf32>
    %cst_11 = arith.constant dense<0.000000e+00> : vector<16x128xf32>
    %16 = tpu.matmul %14, %15, %cst_11 {dimension_numbers = #tpu.dot_dimension_numbers<[1], [0], [0], [1], [0, 0, 1, 1], [], []>} : vector<16x128xf32>, vector<128x128xf32>, vector<16x128xf32> -> vector<16x128xf32>
    %c0_i32 = arith.constant 0 : i32
    %17 = arith.cmpi eq, %arg1, %c0_i32 : i32
    %18 = arith.extui %17 : i1 to i32
    %c0_i32_12 = arith.constant 0 : i32
    %19 = arith.cmpi ne, %18, %c0_i32_12 : i32
    scf.if %19 {
      %c0_17 = arith.constant 0 : index
      %c0_18 = arith.constant 0 : index
      %26 = vector.load %arg8[%c0_17, %c0_18] : memref<16x128xf32, #tpu.memory_space<vmem>>, vector<16x128xf32>
      tpu.vector_store %arg8[%c0_17, %c0_18], %16 {strides = array<i32>} : memref<16x128xf32, #tpu.memory_space<vmem>>, vector<16x128xf32>,
    } else {
    }
    %c0_i32_13 = arith.constant 0 : i32
    %20 = arith.cmpi sgt, %arg1, %c0_i32_13 : i32
    %21 = arith.extui %20 : i1 to i32
    %c0_i32_14 = arith.constant 0 : i32
    %22 = arith.cmpi ne, %21, %c0_i32_14 : i32
    scf.if %22 {
      %c0_17 = arith.constant 0 : index
      %c0_18 = arith.constant 0 : index
      %26 = vector.load %arg8[%c0_17, %c0_18] : memref<16x128xf32, #tpu.memory_space<vmem>>, vector<16x128xf32>
      %27 = arith.addf %26, %16 : vector<16x128xf32>
      %c0_19 = arith.constant 0 : index
      %c0_20 = arith.constant 0 : index
      %28 = vector.load %arg8[%c0_19, %c0_20] : memref<16x128xf32, #tpu.memory_space<vmem>>, vector<16x128xf32>
      tpu.vector_store %arg8[%c0_19, %c0_20], %27 {strides = array<i32>} : memref<16x128xf32, #tpu.memory_space<vmem>>, vector<16x128xf32>,
    } else {
    }
    %c0_i32_15 = arith.constant 0 : i32
    %23 = arith.cmpi eq, %arg1, %c0_i32_15 : i32
    %24 = arith.extui %23 : i1 to i32
    %c0_i32_16 = arith.constant 0 : i32
    %25 = arith.cmpi ne, %24, %c0_i32_16 : i32
    scf.if %25 {
      %c0_17 = arith.constant 0 : index
      %c0_18 = arith.constant 0 : index
      %26 = vector.load %arg8[%c0_17, %c0_18] : memref<16x128xf32, #tpu.memory_space<vmem>>, vector<16x128xf32>
      %c0_19 = arith.constant 0 : index
      %c0_20 = arith.constant 0 : index
      %27 = vector.load %arg6[%c0_19, %c0_20] : memref<1x128xf32, #tpu.memory_space<vmem>>, vector<1x128xf32>
      %28 = vector.broadcast %27 : vector<1x128xf32> to vector<16x128xf32>
      %29 = arith.addf %26, %28 : vector<16x128xf32>
      %c0_21 = arith.constant 0 : index
      %c0_22 = arith.constant 0 : index
      %30 = vector.load %arg7[%c0_21, %c0_22] : memref<16x128xf32, #tpu.memory_space<vmem>>, vector<16x128xf32>
      tpu.vector_store %arg7[%c0_21, %c0_22], %29 {strides = array<i32>} : memref<16x128xf32, #tpu.memory_space<vmem>>, vector<16x128xf32>,
    } else {
    }
    return
  }
  func.func @transform_0(%arg0: i32, %arg1: i32) -> (i32, i32) {
    %c0_i32 = arith.constant 0 : i32
    %c0_i32_0 = arith.constant 0 : i32
    return %arg0, %c0_i32 : i32, i32
  }
  func.func @transform_1(%arg0: i32, %arg1: i32) -> (i32, i32, i32) {
    %c0_i32 = arith.constant 0 : i32
    %c0_i32_0 = arith.constant 0 : i32
    %c0_i32_1 = arith.constant 0 : i32
    return %arg1, %c0_i32, %c0_i32_0 : i32, i32, i32
  }
  func.func @transform_2(%arg0: i32, %arg1: i32) -> (i32, i32) {
    %c0_i32 = arith.constant 0 : i32
    %c0_i32_0 = arith.constant 0 : i32
    return %c0_i32, %arg1 : i32, i32
  }
  func.func @transform_3(%arg0: i32, %arg1: i32) -> (i32, i32) {
    %c0_i32 = arith.constant 0 : i32
    %c0_i32_0 = arith.constant 0 : i32
    return %arg1, %c0_i32 : i32, i32
  }
  func.func @transform_4(%arg0: i32, %arg1: i32) -> (i32, i32) {
    %c0_i32 = arith.constant 0 : i32
    %c0_i32_0 = arith.constant 0 : i32
    %c0_i32_1 = arith.constant 0 : i32
    return %c0_i32, %c0_i32_0 : i32, i32
  }
  func.func @transform_5(%arg0: i32, %arg1: i32) -> (i32, i32) {
    %c0_i32 = arith.constant 0 : i32
    %c0_i32_0 = arith.constant 0 : i32
    return %arg0, %c0_i32 : i32, i32
  }
}

</mosaic_0001>

<bundles_post_ra>
// kernel: tpu_custom_call.1
= control target key start
LH: loop header
LB: loop body
LE: loop exit
PB: predicated region body
PF: predicated region fallthrough
CT: control target
= control target key end

     0   :  { %10 = vsyncpa [#allocation4], 0  ;;  %s698_s0 = inlined_call_operand.hbm [shape: f32[16,128], index: 0, kind: input, shape index: {}]   ;;  %s699_s1 = inlined_call_operand.hbm [shape: f32[1,128,128], index: 1, kind: input, shape index: {}]   ;;  %s700_s2 = inlined_call_operand.vmem [shape: f32[1,128], index: 2, kind: input, shape index: {}]   ;;  %s701_s3 = inlined_call_operand.hbm [shape: f32[128,128], index: 3, kind: input, shape index: {}]   ;;  %s702_s4 = inlined_call_operand.vmem [shape: f32[1,128], index: 4, kind: input, shape index: {}]   ;;  %s703_s5 = inlined_call_operand.hbm [shape: f32[16,128], index: 5, kind: output, shape index: {}]  }
   0x1   :  { %11 = vsyncpa [#allocation7], 0 }
   0x2   :  { %12 = vsyncpa [#allocation5], 0  ;;  %s589_s18 = smov [#allocation6]   ;;  %s590_s20 = smov [#allocation3]  }
   0x3   :  { %s30_s19 = sshll.u32 %s589_s18, 4  ;;  %s18_s21 = sshll.u32 %s590_s20, 4  ;;  %s31_s19 = int_to_ptr.vmem [resolvable:$true] %s30_s19  ;;  %s625_s21 = int_to_ptr.vmem [resolvable:$true] %s18_s21 }
   0x4   :  { %s495_s24 = scalar_lea.hbm %s699_s1, 2048 }
   0x5   :  { %p496_p0 = scmp.ne.s32.totalorder %s699_s1, %s495_s24  ;;  %p499_p1 = scmp.lt.u32.totalorder %s495_s24, %s699_s1 }
   0x7   :  { %p501_p2 = pnand %p499_p1, %p496_p0 }
   0x9   :  { %504 = shalt.err (!%p501_p2)
}
   0xa   :  { %s505_s29 = scalar_lea.vmem %s31_s19, 2048  ;;  %p510_p4 = scmp.lt.s32.totalorder %s31_s19, %s31_s19 }
   0xb   :  { %p506_p3 = scmp.ne.s32.totalorder %s31_s19, %s505_s29  ;;  %p511_p5 = scmp.lt.s32.totalorder %s505_s29, %s505_s29 }
   0xd   :  { %p512_p6 = por %p511_p5, %p510_p4 }
   0xf   :  { %p513_p7 = pnand %p512_p6, %p506_p3 }
  0x11   :  { %516 = shalt.err (!%p513_p7)
}
  0x12   :  { %s591_s30 = smov 128   ;;  %s592_s6 = smov 8  }
  0x13   :  { %36 = dma.hbm_to_vmem [thread:$0]  %s699_s1, 2048, %s31_s19, [#allocation7], %s591_s30, %s591_s30, %s592_s6  }
  0x14   :  { %s517_s11 = scalar_lea.hbm %s698_s0, 256 }
  0x15   :  { %p518_p8 = scmp.ne.s32.totalorder %s698_s0, %s517_s11  ;;  %p521_p9 = scmp.lt.u32.totalorder %s517_s11, %s698_s0 }
  0x17   :  { %p523_p10 = pnand %p521_p9, %p518_p8 }
  0x19   :  { %526 = shalt.err (!%p523_p10)
}
  0x1a   :  { %s527_s16 = scalar_lea.vmem %s625_s21, 256  ;;  %p532_p12 = scmp.lt.s32.totalorder %s625_s21, %s625_s21 }
  0x1b   :  { %p528_p11 = scmp.ne.s32.totalorder %s625_s21, %s527_s16  ;;  %p533_p13 = scmp.lt.s32.totalorder %s527_s16, %s527_s16 }
  0x1d   :  { %p534_p0 = por %p533_p13, %p532_p12 }
  0x1f   :  { %p535_p1 = pnand %p534_p0, %p528_p11 }
  0x21   :  { %538 = shalt.err (!%p535_p1)
}
  0x22   :  { %24 = dma.hbm_to_vmem [thread:$0]  %s698_s0, 256, %s625_s21, [#allocation4], %s591_s30, %s591_s30, %s592_s6  }
  0x23   :  { %s593_s18 = smov [#allocation8]   ;;  %s539_s23 = scalar_lea.hbm %s701_s3, 2048 }
  0x24   :  { %s44_s19 = sshll.u32 %s593_s18, 4  ;;  %p540_p2 = scmp.ne.s32.totalorder %s701_s3, %s539_s23  ;;  %s45_s19 = int_to_ptr.vmem [resolvable:$true] %s44_s19 }
  0x25   :  { %p543_p3 = scmp.lt.u32.totalorder %s539_s23, %s701_s3 }
  0x27   :  { %p545_p4 = pnand %p543_p3, %p540_p2 }
  0x29   :  { %548 = shalt.err (!%p545_p4)
}
  0x2a   :  { %s549_s28 = scalar_lea.vmem %s45_s19, 2048  ;;  %p554_p6 = scmp.lt.s32.totalorder %s45_s19, %s45_s19 }
  0x2b   :  { %p550_p5 = scmp.ne.s32.totalorder %s45_s19, %s549_s28  ;;  %p555_p7 = scmp.lt.s32.totalorder %s549_s28, %s549_s28 }
  0x2d   :  { %p556_p8 = por %p555_p7, %p554_p6 }
  0x2f   :  { %p557_p9 = pnand %p556_p8, %p550_p5 }
  0x31   :  { %560 = shalt.err (!%p557_p9)
}
  0x32   :  { %50 = dma.hbm_to_vmem [thread:$0]  %s701_s3, 2048, %s45_s19, [#allocation7], %s591_s30, %s591_s30, %s592_s6  }
  0x33   :  { %583 = dma.done.wait [#allocation4], 256  }
  0x34   :  { %584 = vsyncadd [#allocation4], 4294967040 }
  0x35   :  { %585 = dma.done.wait [#allocation7], 4096  }
  0x36   :  { %586 = vsyncadd [#allocation7], 4294963200  ;;  %v64_v0 = vld [vmem:[#allocation6] sm:$0xff]  ;;  %v65_v1 = vld [vmem:[#allocation6 + $0x8] sm:$0xff]  ;;  %s594_s8 = smov [#allocation9]  }
  0x37   :  { %v66_v2 = vld [vmem:[#allocation6 + $0x10] sm:$0xff]  ;;  %v421_v3 = vpack.c.bf16 %v65_v1, %v64_v0  ;;  %v67_v4 = vld [vmem:[#allocation6 + $0x18] sm:$0xff]  ;;  %v68_v6 = vld [vmem:[#allocation6 + $0x20] sm:$0xff]  ;;  %s300_s9 = sshll.u32 %s594_s8, 4  ;;  %s301_s9 = int_to_ptr.vmem [resolvable:$true] %s300_s9 }
  0x38   :  { %v425_v5 = vpack.c.bf16 %v67_v4, %v66_v2  ;;  %v69_v7 = vld [vmem:[#allocation6 + $0x28] sm:$0xff]  ;;  %v70_v9 = vld [vmem:[#allocation6 + $0x30] sm:$0xff]  ;;  %v71_v10 = vld [vmem:[#allocation6 + $0x38] sm:$0xff]  ;;  %s561_s10 = scalar_lea.vmem %s301_s9, 256  ;;  %p566_p11 = scmp.lt.s32.totalorder %s301_s9, %s301_s9 }
  0x39   :  { %422 = vmatprep.subr.bf16.mxu0 %v421_v3  ;;  %v429_v8 = vpack.c.bf16 %v69_v7, %v68_v6  ;;  %v62_v11 = vld [vmem:[#allocation3] sm:$0xff]  ;;  %v172_v12 = vld [vmem:[#allocation8] sm:$0xff]  ;;  %v173_v13 = vld [vmem:[#allocation8 + $0x8] sm:$0xff]  ;;  %v433_v20 = vpack.c.bf16 %v71_v10, %v70_v9  ;;  %p562_p10 = scmp.ne.s32.totalorder %s301_s9, %s561_s10  ;;  %p567_p12 = scmp.lt.s32.totalorder %s561_s10, %s561_s10 }
  0x3a   :  { %424 = vmatpush3.bf16.msra.mxu0 %v421_v3  ;;  %383 = vmatprep.mubr.f32.mxu0 %v62_v11  ;;  %v174_v14 = vld [vmem:[#allocation8 + $0x10] sm:$0xff]  ;;  %v453_v15 = vpack.c.bf16 %v173_v13, %v172_v12  ;;  %v175_v16 = vld [vmem:[#allocation8 + $0x18] sm:$0xff]  ;;  %v176_v18 = vld [vmem:[#allocation8 + $0x20] sm:$0xff] }
  0x3b   :  { %426 = vmatprep.subr.bf16.mxu0 %v425_v5  ;;  %v457_v17 = vpack.c.bf16 %v175_v16, %v174_v14  ;;  %v177_v19 = vld [vmem:[#allocation8 + $0x28] sm:$0xff]  ;;  %v72_v21 = vld [vmem:[#allocation6 + $0x40] sm:$0xff]  ;;  %v74_v25 = vld [vmem:[#allocation6 + $0x50] sm:$0xff]  ;;  %p568_p13 = por %p567_p12, %p566_p11 }
  0x3c   :  { %454 = vmatprep.subr.bf16.mxu1 %v453_v15  ;;  %v73_v22 = vld [vmem:[#allocation6 + $0x48] sm:$0xff]  ;;  %v461_v23 = vpack.c.bf16 %v177_v19, %v176_v18  ;;  %v75_v26 = vld [vmem:[#allocation6 + $0x58] sm:$0xff]  ;;  %v76_v28 = vld [vmem:[#allocation6 + $0x60] sm:$0xff] }
  0x3d   :  { %456 = vmatpush3.bf16.msra.mxu1 %v453_v15  ;;  %v437_v24 = vpack.c.bf16 %v73_v22, %v72_v21  ;;  %v441_v27 = vpack.c.bf16 %v75_v26, %v74_v25  ;;  %v77_v29 = vld [vmem:[#allocation6 + $0x68] sm:$0xff]  ;;  %v78_v31 = vld [vmem:[#allocation6 + $0x70] sm:$0xff]  ;;  %v79_v32 = vld [vmem:[#allocation6 + $0x78] sm:$0xff]  ;;  %p569_p0 = pnand %p568_p13, %p562_p10 }
  0x3e   :  { %428 = vmatpush3.bf16.msra.mxu0 %v425_v5  ;;  %458 = vmatprep.subr.bf16.mxu1 %v457_v17  ;;  %v445_v30 = vpack.c.bf16 %v77_v29, %v76_v28  ;;  %v449_v33 = vpack.c.bf16 %v79_v32, %v78_v31  ;;  %v63_v34 = vld [vmem:[#allocation3 + $0x8] sm:$0xff]  ;;  %v178_v35 = vld [vmem:[#allocation8 + $0x30] sm:$0xff]  ;;  %v180_v38 = vld [vmem:[#allocation8 + $0x40] sm:$0xff] }
  0x3f   :  { %430 = vmatprep.subr.bf16.mxu0 %v429_v8  ;;  %v179_v36 = vld [vmem:[#allocation8 + $0x38] sm:$0xff]  ;;  %v181_v39 = vld [vmem:[#allocation8 + $0x48] sm:$0xff]  ;;  %v182_v41 = vld [vmem:[#allocation8 + $0x50] sm:$0xff] }
  0x40   :  { %v465_v37 = vpack.c.bf16 %v179_v36, %v178_v35  ;;  %v469_v40 = vpack.c.bf16 %v181_v39, %v180_v38  ;;  %v183_v42 = vld [vmem:[#allocation8 + $0x58] sm:$0xff]  ;;  %v184_v44 = vld [vmem:[#allocation8 + $0x60] sm:$0xff]  ;;  %v185_v45 = vld [vmem:[#allocation8 + $0x68] sm:$0xff] }
  0x41   :  { %460 = vmatpush3.bf16.msra.mxu1 %v457_v17  ;;  %v473_v43 = vpack.c.bf16 %v183_v42, %v182_v41  ;;  %v477_v46 = vpack.c.bf16 %v185_v45, %v184_v44  ;;  %v186_v47 = vld [vmem:[#allocation8 + $0x70] sm:$0xff]  ;;  %v187_v48 = vld [vmem:[#allocation8 + $0x78] sm:$0xff] }
  0x42   :  { %432 = vmatpush3.bf16.msra.mxu0 %v429_v8  ;;  %462 = vmatprep.subr.bf16.mxu1 %v461_v23  ;;  %v481_v49 = vpack.c.bf16 %v187_v48, %v186_v47  ;;  %v313_v50 = vld [vmem:[%s700_s2] ss:$0 sm:$0xff] }
  0x43   :  { %434 = vmatprep.subr.bf16.mxu0 %v433_v20  ;;  %v314_v1 = vld [vmem:[%s702_s4] ss:$0 sm:$0xff] }
  0x45   :  { %464 = vmatpush3.bf16.msra.mxu1 %v461_v23 }
  0x46   :  { %436 = vmatpush3.bf16.msra.mxu0 %v433_v20  ;;  %466 = vmatprep.subr.bf16.mxu1 %v465_v37 }
  0x47   :  { %438 = vmatprep.subr.bf16.mxu0 %v437_v24 }
  0x49   :  { %468 = vmatpush3.bf16.msra.mxu1 %v465_v37 }
  0x4a   :  { %440 = vmatpush3.bf16.msra.mxu0 %v437_v24  ;;  %470 = vmatprep.subr.bf16.mxu1 %v469_v40 }
  0x4b   :  { %442 = vmatprep.subr.bf16.mxu0 %v441_v27 }
  0x4d   :  { %472 = vmatpush3.bf16.msra.mxu1 %v469_v40 }
  0x4e   :  { %444 = vmatpush3.bf16.msra.mxu0 %v441_v27  ;;  %474 = vmatprep.subr.bf16.mxu1 %v473_v43 }
  0x4f   :  { %446 = vmatprep.subr.bf16.mxu0 %v445_v30 }
  0x51   :  { %476 = vmatpush3.bf16.msra.mxu1 %v473_v43 }
  0x52   :  { %448 = vmatpush3.bf16.msra.mxu0 %v445_v30  ;;  %478 = vmatprep.subr.bf16.mxu1 %v477_v46 }
  0x53   :  { %450 = vmatprep.subr.bf16.mxu0 %v449_v33 }
  0x55   :  { %480 = vmatpush3.bf16.msra.mxu1 %v477_v46 }
  0x56   :  { %452 = vmatpush3.bf16.msra.mxu0 %v449_v33  ;;  %482 = vmatprep.subr.bf16.mxu1 %v481_v49 }
  0x59   :  { %384 = vmatmul.mubr.f32.vlgmr.msra.gmra.mrb[0].mxu0 %v63_v34  ;;  %484 = vmatpush3.bf16.msra.mxu1 %v481_v49 }
 0x12c   :  { %v385_v51 = vpop.f32.mrb[0].mxu0 }
 0x12d   :  { %v159_v52 = vadd.f32 %v385_v51, %v313_v50  ;;  %v153_v53 = vpop.f32.mrb[1].mxu0 }
 0x12e   :  { %v154_v54 = vadd.f32 %v313_v50, %v153_v53 }
 0x12f   :  { %v165_v55 = vmul.f32 0.70710677, %v159_v52  ;;  %v163_v62 = vmul.f32 0.5, %v159_v52 }
 0x130   :  { %v164_v56 = vmul.f32 0.70710677, %v154_v54  ;;  %v162_v60 = vmul.f32 0.5, %v154_v54 }
 0x131   :  { %491 = verf.f32 %v165_v55 }
 0x132   :  { %493 = verf.f32 %v164_v56 }
 0x13b   :  { %v492_v57 = vpop.eup %491 }
 0x13c   :  { %v494_v58 = vpop.eup %493  ;;  %v169_v59 = vadd.f32 1.0, %v492_v57 }
 0x13d   :  { %v168_v61 = vadd.f32 1.0, %v494_v58 }
 0x13e   :  { %v171_v0 = vmul.f32 %v169_v59, %v163_v62 }
 0x13f   :  { %v170_v63 = vmul.f32 %v168_v61, %v162_v60 }
 0x141   :  { %418 = vmatprep.mubr.f32.mxu1 %v170_v63 }
 0x142   :  { %419 = vmatmul.mubr.f32.vlgmr.msra.gmra.mrb[0].mxu1 %v171_v0 }
 0x215   :  { %v420_v2 = vpop.f32.mrb[0].mxu1 }
 0x216   :  { %v292_v3 = vadd.f32 %v420_v2, %v314_v1  ;;  %v254_v4 = vpop.f32.mrb[1].mxu1 }
 0x217   :  { %v291_v5 = vadd.f32 %v314_v1, %v254_v4 }
 0x218   :  { %294 = vst [vmem:[#allocation9 + $0x8] sm:$0xff] %v292_v3 }
 0x219   :  { %293 = vst [vmem:[#allocation9] sm:$0xff] %v291_v5 }
 0x21a   :  { %572 = shalt.err (!%p569_p0)
}
 0x21b   :  { %s573_s4 = scalar_lea.hbm %s703_s5, 256 }
 0x21c   :  { %p574_p1 = scmp.ne.s32.totalorder %s703_s5, %s573_s4  ;;  %p577_p2 = scmp.lt.u32.totalorder %s573_s4, %s703_s5 }
 0x21e   :  { %p579_p3 = pnand %p577_p2, %p574_p1 }
 0x220   :  { %582 = shalt.err (!%p579_p3)
}
 0x221   :  { %306 = dma.vmem_to_hbm [thread:$0]  %s301_s9, 256, %s703_s5, [#allocation5], %s591_s30, %s591_s30, %s592_s6  }
 0x222   :  { %587 = dma.done.wait [#allocation5], 256  }
 0x223   :  { %588 = vsyncadd [#allocation5], 4294967040 }
 0x224   :  { %310 = vsyncpa [#allocation4], 1 }
 0x225   :  { %311 = vsyncpa [#allocation7], 1 }
 0x226   :  { %312 = vsyncpa [#allocation5], 1 }

</bundles_post_ra>
